<compile_context>
chip_gen: v5e
topology: v5e:2x2
jax: 0.10.0
libtpu: 0.0.40
codegen_flags: <defaults>
</compile_context>

<pallas_src>
import functools

import jax
import jax.numpy as jnp
import numpy as np
from jax.experimental import pallas as pl
from jax.experimental.pallas import tpu as pltpu

# ------------------------- model config (small) -------------------------
N_INPUT = 1
N_OUTPUT = 1
N_HIDDEN = 32          # multiple of 8 -> clean sublane extent, no padding needed
N_LAYERS = 3           # -> 1 input layer, (N_LAYERS-1)=2 hidden layers, 1 output layer


def oscilador_amort(d, w0, t):
    """Damped harmonic oscillator reference solution (used to build an input signal)."""
    assert d < w0
    w = np.sqrt(w0 ** 2 - d ** 2)
    phi = np.arctan(-d / w)
    A = 1.0 / (2.0 * np.cos(phi))
    cos = jnp.cos(phi + w * t)
    exp = jnp.exp(-d * t)
    return exp * 2.0 * A * cos


# ------------------------- Pallas kernel (batch-on-lanes) -------------------------
def pinn_kernel(x_ref, w_in_ref, b_in_ref, wh_ref, bh_ref, w_out_ref, b_out_ref,
                o_ref, *, n_hidden_layers):
    # Layout: H[j, b] = activation j (sublanes, 32) for batch element b (lanes, TM).
    #
    # Input layer: x has a single feature, so this is a rank-1 outer product on
    # the VPU:  (HID, 1) * (1, TM) + (HID, 1) -> (HID, TM), then tanh (EUP).
    h = jnp.tanh(w_in_ref[...] * x_ref[...] + b_in_ref[...])

    # Hidden layers: H <- tanh(W^T H + b), static unrolled loop on the MXU.
    # wh_ref holds the pre-transposed (out, in) weights, so K = 32 (not 128).
    for l in range(n_hidden_layers):
        h = jnp.tanh(
            jnp.dot(wh_ref[l], h, preferred_element_type=jnp.float32)
            + bh_ref[l]
        )

    # Output layer: single useful output row -> sublane reduction (VPU mul +
    # XLU reduce) instead of a matmul; b_out read as an SMEM scalar.
    # Result is a lane-dense (1, TM) slab -> unmasked vst writeback.
    o_ref[...] = (
        jnp.sum(h * w_out_ref[...], axis=0, keepdims=True) + b_out_ref[0, 0]
    ).astype(o_ref.dtype)


# ------------------- one-time parameter repack (hoisted out of hot path) ----------
def pack_params(params):
    """Transpose/reshape raw params once into the batch-on-lanes kernel layout."""
    w_in, b_in, wh, bh, w_out, b_out = params
    L = wh.shape[0]
    w_in_col = w_in.reshape(N_INPUT, N_HIDDEN).T.astype(jnp.float32)     # (HID, 1)
    b_in_col = b_in.reshape(N_HIDDEN, 1).astype(jnp.float32)             # (HID, 1)
    wh_t = jnp.transpose(wh, (0, 2, 1)).astype(jnp.float32)              # (L, HID, HID), (out, in)
    bh_col = bh.reshape(L, N_HIDDEN, 1).astype(jnp.float32)              # (L, HID, 1)
    w_out_col = w_out.reshape(N_HIDDEN, N_OUTPUT).astype(jnp.float32)    # (HID, 1)
    b_out_sc = b_out.reshape(1, 1).astype(jnp.float32)                   # (1, 1) -> SMEM
    return (w_in_col, b_in_col, wh_t, bh_col, w_out_col, b_out_sc)


def _pick_tm(n):
    """Batch tile: 1 grid step on single-TC chips, 2 parallel steps on 2-TC parts."""
    try:
        kind = jax.devices()[0].device_kind.lower()
    except Exception:  # pragma: no cover - be permissive about exotic runtimes
        kind = ""
    multi_tc = ("v7" in kind) or ("v4" in kind) or ("v5p" in kind)
    if multi_tc and n % 256 == 0:
        return n // 2          # one TM tile per TensorCore
    return n                   # v5e / v6e: grid=1, zero per-step overhead


# ------------------------- forward wrapper -------------------------
def pinn_forward(x, packed_params, tm=None):
    """x: [N, N_INPUT] float32 (N_INPUT == 1).  Returns [N, N_OUTPUT]."""
    w_in_col, b_in_col, wh_t, bh_col, w_out_col, b_out_sc = packed_params
    N = x.shape[0]
    assert x.shape[1] == N_INPUT == 1
    if tm is None:
        tm = _pick_tm(N)
    assert tm % 128 == 0 and N % tm == 0, "pad the batch to a multiple of the tile"
    n_hidden_layers = wh_t.shape[0]

    x_row = x.reshape(1, N)  # batch on lanes (cheap one-time reshape in the wrapper)

    kernel = functools.partial(pinn_kernel, n_hidden_layers=n_hidden_layers)

    out_row = pl.pallas_call(
        kernel,
        out_shape=jax.ShapeDtypeStruct((1, N), jnp.float32),
        grid_spec=pltpu.PrefetchScalarGridSpec(
            num_scalar_prefetch=0,
            grid=(N // tm,),
            in_specs=[
                pl.BlockSpec((1, tm), lambda i: (0, i)),                           # x tile (lane-dense)
                pl.BlockSpec((N_HIDDEN, 1), lambda i: (0, 0)),                     # w_in column
                pl.BlockSpec((N_HIDDEN, 1), lambda i: (0, 0)),                     # b_in column
                pl.BlockSpec((n_hidden_layers, N_HIDDEN, N_HIDDEN),
                             lambda i: (0, 0, 0)),                                 # wh (stacked, pre-transposed)
                pl.BlockSpec((n_hidden_layers, N_HIDDEN, 1), lambda i: (0, 0, 0)), # bh (stacked)
                pl.BlockSpec((N_HIDDEN, 1), lambda i: (0, 0)),                     # w_out column
                pl.BlockSpec(memory_space=pltpu.SMEM),                             # b_out scalar in SMEM
            ],
            out_specs=pl.BlockSpec((1, tm), lambda i: (0, i)),                     # lane-dense output slab
        ),
        compiler_params=pltpu.CompilerParams(
            dimension_semantics=("parallel",)),
    )(x_row, w_in_col, b_in_col, wh_t, bh_col, w_out_col, b_out_sc)

    return out_row.reshape(N, N_OUTPUT)


# ------------------- parameter init (deterministic, PyTorch-style) -------------------
def init_params(key):
    # PyTorch nn.Linear default: U(-1/sqrt(fan_in), 1/sqrt(fan_in)).
    # Weights stored as (in, out) so the reference computes x @ W + b.
    n_hidden_layers = N_LAYERS - 1
    ks = jax.random.split(key, 4 + 2 * n_hidden_layers)

    def unif(k, shape, fan_in):
        bound = 1.0 / np.sqrt(fan_in)
        return jax.random.uniform(k, shape, jnp.float32, -bound, bound)

    w_in = unif(ks[0], (N_INPUT, N_HIDDEN), N_INPUT)
    b_in = unif(ks[1], (N_HIDDEN,), N_INPUT)
    wh = jnp.stack([unif(ks[2 + 2 * l], (N_HIDDEN, N_HIDDEN), N_HIDDEN)
                    for l in range(n_hidden_layers)])
    bh = jnp.stack([unif(ks[3 + 2 * l], (N_HIDDEN,), N_HIDDEN)
                    for l in range(n_hidden_layers)])
    w_out = unif(ks[2 + 2 * n_hidden_layers], (N_HIDDEN, N_OUTPUT), N_HIDDEN)
    b_out = unif(ks[3 + 2 * n_hidden_layers], (N_OUTPUT,), N_HIDDEN)
    return (w_in, b_in, wh, bh, w_out, b_out)


def pinn_reference(x, params):
    """Pure-JAX reference matching the PyTorch forward."""
    w_in, b_in, wh, bh, w_out, b_out = params
    h = jnp.tanh(x @ w_in + b_in)
    for l in range(wh.shape[0]):
        h = jnp.tanh(h @ wh[l] + bh[l])
    return h @ w_out + b_out


if __name__ == "__main__":
    key = jax.random.PRNGKey(0)
    params = init_params(key)
    packed_params = pack_params(params)   # repacked ONCE, outside the hot path

    # Input: t in [0,1] (the PyTorch script uses 500 points; use 512 for tiling).
    N = 512
    t = jnp.linspace(0.0, 1.0, N, dtype=jnp.float32).reshape(-1, 1)
    # (also exercise the damped-oscillator helper; the PINN consumes t directly)
    _x_signal = oscilador_amort(2.0, 20.0, t)

    out = pinn_forward(t, packed_params)
    out = jax.block_until_ready(out)

    ref = pinn_reference(t, params)
    np.testing.assert_allclose(np.asarray(out), np.asarray(ref), rtol=1e-5, atol=1e-5)

    print("KERNEL_OK")
</pallas_src>

<mosaic_0001>
module attributes {stable_mosaic.version = 11 : i64} {
  func.func @pinn_kernel(%arg0: i32, %arg1: memref<1x512xf32, #tpu.memory_space<vmem>>, %arg2: memref<32x1xf32, #tpu.memory_space<vmem>>, %arg3: memref<32x1xf32, #tpu.memory_space<vmem>>, %arg4: memref<2x32x32xf32, #tpu.memory_space<vmem>>, %arg5: memref<2x32x1xf32, #tpu.memory_space<vmem>>, %arg6: memref<32x1xf32, #tpu.memory_space<vmem>>, %arg7: memref<1x1xf32, #tpu.memory_space<smem>>, %arg8: memref<1x512xf32, #tpu.memory_space<vmem>>) attributes {dimension_semantics = [#tpu.dimension_semantics<parallel>], iteration_bounds = array<i64: 1>, scalar_prefetch = 0 : i64, scratch_operands = 0 : i64, tpu.core_type = #tpu.core_type<tc>, window_params = [{transform_indices = @transform_0, window_bounds = array<i64: 1, 512>}, {pipeline_mode = #tpu.pipeline_mode<synchronous>, transform_indices = @transform_1, window_bounds = array<i64: 32, 1>}, {pipeline_mode = #tpu.pipeline_mode<synchronous>, transform_indices = @transform_2, window_bounds = array<i64: 32, 1>}, {pipeline_mode = #tpu.pipeline_mode<synchronous>, transform_indices = @transform_3, window_bounds = array<i64: 2, 32, 32>}, {pipeline_mode = #tpu.pipeline_mode<synchronous>, transform_indices = @transform_4, window_bounds = array<i64: 2, 32, 1>}, {pipeline_mode = #tpu.pipeline_mode<synchronous>, transform_indices = @transform_5, window_bounds = array<i64: 32, 1>}, {transform_indices = @transform_6, window_bounds = array<i64: 1, 1>}, {transform_indices = @transform_7, window_bounds = array<i64: 1, 512>}]} {
    %c0 = arith.constant 0 : index
    %c0_0 = arith.constant 0 : index
    %0 = vector.load %arg2[%c0, %c0_0] : memref<32x1xf32, #tpu.memory_space<vmem>>, vector<32x1xf32>
    %c0_1 = arith.constant 0 : index
    %c0_2 = arith.constant 0 : index
    %1 = vector.load %arg1[%c0_1, %c0_2] : memref<1x512xf32, #tpu.memory_space<vmem>>, vector<1x512xf32>
    %2 = vector.broadcast %0 : vector<32x1xf32> to vector<32x512xf32>
    %3 = vector.broadcast %1 : vector<1x512xf32> to vector<32x512xf32>
    %4 = arith.mulf %2, %3 : vector<32x512xf32>
    %c0_3 = arith.constant 0 : index
    %c0_4 = arith.constant 0 : index
    %5 = vector.load %arg3[%c0_3, %c0_4] : memref<32x1xf32, #tpu.memory_space<vmem>>, vector<32x1xf32>
    %6 = vector.broadcast %5 : vector<32x1xf32> to vector<32x512xf32>
    %7 = arith.addf %4, %6 : vector<32x512xf32>
    %8 = math.tanh %7 : vector<32x512xf32>
    %c0_5 = arith.constant 0 : index
    %c0_6 = arith.constant 0 : index
    %c0_7 = arith.constant 0 : index
    %9 = vector.load %arg4[%c0_5, %c0_6, %c0_7] : memref<2x32x32xf32, #tpu.memory_space<vmem>>, vector<1x32x32xf32>
    %10 = vector.shape_cast %9 : vector<1x32x32xf32> to vector<32x32xf32>
    %cst = arith.constant dense<0.000000e+00> : vector<32x512xf32>
    %11 = tpu.matmul %10, %8, %cst {dimension_numbers = #tpu.dot_dimension_numbers<[1], [0], [0], [1], [0, 0, 1, 1], [], []>} : vector<32x32xf32>, vector<32x512xf32>, vector<32x512xf32> -> vector<32x512xf32>
    %c0_8 = arith.constant 0 : index
    %c0_9 = arith.constant 0 : index
    %c0_10 = arith.constant 0 : index
    %12 = vector.load %arg5[%c0_8, %c0_9, %c0_10] : memref<2x32x1xf32, #tpu.memory_space<vmem>>, vector<1x32x1xf32>
    %13 = vector.shape_cast %12 : vector<1x32x1xf32> to vector<32x1xf32>
    %14 = vector.broadcast %13 : vector<32x1xf32> to vector<32x512xf32>
    %15 = arith.addf %11, %14 : vector<32x512xf32>
    %16 = math.tanh %15 : vector<32x512xf32>
    %c1 = arith.constant 1 : index
    %c0_11 = arith.constant 0 : index
    %c0_12 = arith.constant 0 : index
    %17 = vector.load %arg4[%c1, %c0_11, %c0_12] : memref<2x32x32xf32, #tpu.memory_space<vmem>>, vector<1x32x32xf32>
    %18 = vector.shape_cast %17 : vector<1x32x32xf32> to vector<32x32xf32>
    %cst_13 = arith.constant dense<0.000000e+00> : vector<32x512xf32>
    %19 = tpu.matmul %18, %16, %cst_13 {dimension_numbers = #tpu.dot_dimension_numbers<[1], [0], [0], [1], [0, 0, 1, 1], [], []>} : vector<32x32xf32>, vector<32x512xf32>, vector<32x512xf32> -> vector<32x512xf32>
    %c1_14 = arith.constant 1 : index
    %c0_15 = arith.constant 0 : index
    %c0_16 = arith.constant 0 : index
    %20 = vector.load %arg5[%c1_14, %c0_15, %c0_16] : memref<2x32x1xf32, #tpu.memory_space<vmem>>, vector<1x32x1xf32>
    %21 = vector.shape_cast %20 : vector<1x32x1xf32> to vector<32x1xf32>
    %22 = vector.broadcast %21 : vector<32x1xf32> to vector<32x512xf32>
    %23 = arith.addf %19, %22 : vector<32x512xf32>
    %24 = math.tanh %23 : vector<32x512xf32>
    %c0_17 = arith.constant 0 : index
    %c0_18 = arith.constant 0 : index
    %25 = vector.load %arg6[%c0_17, %c0_18] : memref<32x1xf32, #tpu.memory_space<vmem>>, vector<32x1xf32>
    %26 = vector.broadcast %25 : vector<32x1xf32> to vector<32x512xf32>
    %27 = arith.mulf %24, %26 : vector<32x512xf32>
    %cst_19 = arith.constant dense<0.000000e+00> : vector<512xf32>
    %28 = vector.multi_reduction <add>, %27, %cst_19 [0] : vector<32x512xf32> to vector<512xf32>
    %29 = vector.shape_cast %28 : vector<512xf32> to vector<1x512xf32>
    %c0_20 = arith.constant 0 : index
    %c0_21 = arith.constant 0 : index
    %30 = memref.load %arg7[%c0_20, %c0_21] : memref<1x1xf32, #tpu.memory_space<smem>>
    %31 = vector.broadcast %30 : f32 to vector<1x512xf32>
    %32 = arith.addf %29, %31 : vector<1x512xf32>
    %c0_22 = arith.constant 0 : index
    %c0_23 = arith.constant 0 : index
    %33 = vector.load %arg8[%c0_22, %c0_23] : memref<1x512xf32, #tpu.memory_space<vmem>>, vector<1x512xf32>
    tpu.vector_store %arg8[%c0_22, %c0_23], %32 {strides = array<i32>} : memref<1x512xf32, #tpu.memory_space<vmem>>, vector<1x512xf32>,
    return
  }
  func.func @transform_0(%arg0: i32) -> (i32, i32) {
    %c0_i32 = arith.constant 0 : i32
    %c0_i32_0 = arith.constant 0 : i32
    return %c0_i32, %arg0 : i32, i32
  }
  func.func @transform_1(%arg0: i32) -> (i32, i32) {
    %c0_i32 = arith.constant 0 : i32
    %c0_i32_0 = arith.constant 0 : i32
    %c0_i32_1 = arith.constant 0 : i32
    return %c0_i32, %c0_i32_0 : i32, i32
  }
  func.func @transform_2(%arg0: i32) -> (i32, i32) {
    %c0_i32 = arith.constant 0 : i32
    %c0_i32_0 = arith.constant 0 : i32
    %c0_i32_1 = arith.constant 0 : i32
    return %c0_i32, %c0_i32_0 : i32, i32
  }
  func.func @transform_3(%arg0: i32) -> (i32, i32, i32) {
    %c0_i32 = arith.constant 0 : i32
    %c0_i32_0 = arith.constant 0 : i32
    %c0_i32_1 = arith.constant 0 : i32
    %c0_i32_2 = arith.constant 0 : i32
    return %c0_i32, %c0_i32_0, %c0_i32_1 : i32, i32, i32
  }
  func.func @transform_4(%arg0: i32) -> (i32, i32, i32) {
    %c0_i32 = arith.constant 0 : i32
    %c0_i32_0 = arith.constant 0 : i32
    %c0_i32_1 = arith.constant 0 : i32
    %c0_i32_2 = arith.constant 0 : i32
    return %c0_i32, %c0_i32_0, %c0_i32_1 : i32, i32, i32
  }
  func.func @transform_5(%arg0: i32) -> (i32, i32) {
    %c0_i32 = arith.constant 0 : i32
    %c0_i32_0 = arith.constant 0 : i32
    %c0_i32_1 = arith.constant 0 : i32
    return %c0_i32, %c0_i32_0 : i32, i32
  }
  func.func @transform_6(%arg0: i32) -> (i32, i32) {
    %c0_i32 = arith.constant 0 : i32
    %c0_i32_0 = arith.constant 0 : i32
    %c0_i32_1 = arith.constant 0 : i32
    return %c0_i32, %c0_i32_0 : i32, i32
  }
  func.func @transform_7(%arg0: i32) -> (i32, i32) {
    %c0_i32 = arith.constant 0 : i32
    %c0_i32_0 = arith.constant 0 : i32
    return %c0_i32, %arg0 : i32, i32
  }
}

</mosaic_0001>

<bundles_post_ra>
// kernel: tpu_custom_call.1
= control target key start
LH: loop header
LB: loop body
LE: loop exit
PB: predicated region body
PF: predicated region fallthrough
CT: control target
= control target key end

     0   :  { %v765_v3 = vmov 0   ;;  %s938_s0 = inlined_call_operand.vmem [shape: f32[1,512], index: 0, kind: input, shape index: {}]   ;;  %s939_s1 = inlined_call_operand.vmem [shape: f32[32,1], index: 1, kind: input, shape index: {}]   ;;  %s940_s2 = inlined_call_operand.vmem [shape: f32[32,1], index: 2, kind: input, shape index: {}]   ;;  %s941_s3 = inlined_call_operand.vmem [shape: f32[2,32,32], index: 3, kind: input, shape index: {}]   ;;  %s942_s4 = inlined_call_operand.vmem [shape: f32[2,32,1], index: 4, kind: input, shape index: {}]   ;;  %s943_s5 = inlined_call_operand.vmem [shape: f32[32,1], index: 5, kind: input, shape index: {}]   ;;  %s944_s6 = inlined_call_operand.<no memory space> [shape: f32[1,1], index: 6, kind: input, shape index: {}]   ;;  %s945_s7 = inlined_call_operand.hbm [shape: f32[1,512], index: 7, kind: output, shape index: {}]  }
   0x1   :  { %v80_v0 = vld [vmem:[%s940_s2 + $0x10] sm:$0xff]  ;;  %v81_v1 = vld [vmem:[%s940_s2 + $0x18] sm:$0xff]  ;;  %642 = vset.pattern.permute.xlu2 %v765_v3  ;;  %641 = vset.pattern.permute.xlu1 %v765_v3 }
   0x2   :  { %v31_v2 = vld [vmem:[%s939_s1 + $0x18] sm:$0xff]  ;;  %640 = vset.pattern.permute.xlu0 %v765_v3  ;;  %94 = vperm.xlu2 %642, %v80_v0  }
   0x3   :  { %99 = vperm.xlu1 %641, %v81_v1   ;;  %50 = vperm.xlu0 %640, %v31_v2  }
   0x4   :  { %13 = vsyncpa [#allocation4], 0  ;;  %v28_v4 = vld [vmem:[%s939_s1] sm:$0xff]  ;;  %v30_v5 = vld [vmem:[%s939_s1 + $0x10] sm:$0xff]  ;;  %vm162_vm0 = vcmask 261120   ;;  %vm570_vm1 = vcmask 1040384  }
   0x5   :  { %v29_v6 = vld [vmem:[%s939_s1 + $0x8] sm:$0xff]  ;;  %v141_v7 = vld [vmem:[%s942_s4 + $0x18] sm:$0xff]  ;;  %v78_v9 = vld [vmem:[%s940_s2] sm:$0xff]  ;;  %vm572_vm2 = vcmask 1042434   ;;  %s766_s30 = smov [#allocation3]   ;;  %vm574_vm3 = vcmask 1041408  }
   0x6   :  { %v79_v8 = vld [vmem:[%s940_s2 + $0x8] sm:$0xff]  ;;  %v138_v10 = vld [vmem:[%s942_s4] sm:$0xff]  ;;  %v140_v11 = vld [vmem:[%s942_s4 + $0x10] sm:$0xff]  ;;  %s587_s8 = sshll.u32 %s766_s30, 4  ;;  %s588_s8 = int_to_ptr.vmem [resolvable:$true] %s587_s8 }
   0x7   :  { %v139_v12 = vld [vmem:[%s942_s4 + $0x8] sm:$0xff]  ;;  %v620_v13 = vld [vmem:[%s942_s4 + $0x30] sm:$0xff]  ;;  %v618_v14 = vld [vmem:[%s942_s4 + $0x20] sm:$0xff] }
   0x8   :  { %v619_v15 = vld [vmem:[%s942_s4 + $0x28] sm:$0xff]  ;;  %v621_v17 = vld [vmem:[%s942_s4 + $0x38] sm:$0xff]  ;;  %v481_v18 = vld [vmem:[%s943_s5] sm:$0xff] }
   0x9   :  { %v482_v16 = vld [vmem:[%s943_s5 + $0x8] sm:$0xff]  ;;  %v483_v19 = vld [vmem:[%s943_s5 + $0x10] sm:$0xff]  ;;  %v484_v20 = vld [vmem:[%s943_s5 + $0x18] sm:$0xff] }
   0xa   :  { %35 = vperm.xlu2 %642, %v28_v4   ;;  %v32_v21 = vld [vmem:[%s938_s0] sm:$0xf] }
   0xb   :  { %45 = vperm.xlu0 %640, %v30_v5   ;;  %40 = vperm.xlu1 %641, %v29_v6   ;;  %v54_v22 = vperm.slane %v32_v21, 0  ;;  %v55_v23 = vperm.slane %v32_v21, 1  ;;  %v56_v24 = vperm.slane %v32_v21, 2  ;;  %v57_v25 = vperm.slane %v32_v21, 3  ;;  %v137_v21 = vld [vmem:[%s941_s3 + $0x18] sm:$0xff] }
  0x12   :  { %159 = vperm.xlu2 %642, %v141_v7  }
  0x13   :  { %89 = vperm.xlu0 %640, %v79_v8   ;;  %84 = vperm.xlu1 %641, %v78_v9  }
  0x1a   :  { %144 = vperm.xlu2 %642, %v138_v10  }
  0x1b   :  { %154 = vperm.xlu0 %640, %v140_v11   ;;  %149 = vperm.xlu1 %641, %v139_v12  }
  0x22   :  { %329 = vperm.xlu2 %642, %v620_v13  }
  0x23   :  { %319 = vperm.xlu0 %640, %v618_v14   ;;  %324 = vperm.xlu1 %641, %v619_v15   ;;  %v134_v14 = vld [vmem:[%s941_s3] sm:$0xff] }
  0x2a   :  { %492 = vperm.xlu2 %642, %v482_v16  }
  0x2b   :  { %334 = vperm.xlu0 %640, %v621_v17   ;;  %487 = vperm.xlu1 %641, %v481_v18  }
  0x33   :  { %497 = vperm.xlu0 %640, %v483_v19   ;;  %502 = vperm.xlu1 %641, %v484_v20   ;;  %v135_v19 = vld [vmem:[%s941_s3 + $0x8] sm:$0xff]  ;;  %v136_v20 = vld [vmem:[%s941_s3 + $0x10] sm:$0xff] }
  0x5c   :  { %v95_v36 = vpop.permute.xlu2 %94 }
  0x64   :  { %v36_v51 = vpop.permute.xlu2 %35 }
  0x65   :  { %v62_v58 = vmul.f32 %v54_v22, %v36_v51  ;;  %v63_v62 = vmul.f32 %v55_v23, %v36_v51  ;;  %v64_v1 = vmul.f32 %v56_v24, %v36_v51  ;;  %v65_v4 = vmul.f32 %v57_v25, %v36_v51 }
  0x75   :  { %v100_v26 = vpop.permute.xlu1 %99  ;;  %v51_v27 = vpop.permute.xlu0 %50 }
  0x76   :  { %v74_v28 = vmul.f32 %v54_v22, %v51_v27  ;;  %v75_v29 = vmul.f32 %v55_v23, %v51_v27  ;;  %v76_v30 = vmul.f32 %v56_v24, %v51_v27  ;;  %v77_v31 = vmul.f32 %v57_v25, %v51_v27 }
  0x78   :  { %v114_v32 = vadd.f32 %v100_v26, %v74_v28  ;;  %v115_v33 = vadd.f32 %v100_v26, %v75_v29  ;;  %v116_v34 = vadd.f32 %v100_v26, %v76_v30  ;;  %v117_v35 = vadd.f32 %v100_v26, %v77_v31  ;;  %v160_v28 = vpop.permute.xlu2 %159 }
  0x7a   :  { %643 = vtanh.f32 %v114_v32 }
  0x7b   :  { %645 = vtanh.f32 %v115_v33 }
  0x7c   :  { %647 = vtanh.f32 %v116_v34 }
  0x7d   :  { %v46_v37 = vpop.permute.xlu0 %45  ;;  %v41_v38 = vpop.permute.xlu1 %40  ;;  %649 = vtanh.f32 %v117_v35 }
  0x7e   :  { %v70_v39 = vmul.f32 %v54_v22, %v46_v37  ;;  %v71_v40 = vmul.f32 %v55_v23, %v46_v37  ;;  %v72_v41 = vmul.f32 %v56_v24, %v46_v37  ;;  %v73_v42 = vmul.f32 %v57_v25, %v46_v37 }
  0x7f   :  { %v66_v52 = vmul.f32 %v54_v22, %v41_v38  ;;  %v67_v53 = vmul.f32 %v55_v23, %v41_v38  ;;  %v68_v54 = vmul.f32 %v56_v24, %v41_v38  ;;  %v69_v55 = vmul.f32 %v57_v25, %v41_v38 }
  0x80   :  { %v644_v43 = vpop.eup %643  ;;  %v110_v44 = vadd.f32 %v95_v36, %v70_v39  ;;  %v111_v45 = vadd.f32 %v95_v36, %v71_v40  ;;  %v112_v46 = vadd.f32 %v95_v36, %v72_v41  ;;  %v113_v48 = vadd.f32 %v95_v36, %v73_v42  ;;  %v145_v33 = vpop.permute.xlu2 %144 }
  0x81   :  { %v646_v47 = vpop.eup %645  ;;  %187 = vmatpush.msra.mxu0 %v644_v43 }
  0x82   :  { %v648_v49 = vpop.eup %647  ;;  %216 = vmatpush.msra.mxu1 %v646_v47  ;;  %651 = vtanh.f32 %v110_v44 }
  0x83   :  { %v650_v50 = vpop.eup %649  ;;  %245 = vmatpush.msra.mxu2 %v648_v49  ;;  %653 = vtanh.f32 %v111_v45 }
  0x84   :  { %274 = vmatpush.msra.mxu3 %v650_v50  ;;  %655 = vtanh.f32 %v112_v46 }
  0x85   :  { %v90_v56 = vpop.permute.xlu0 %89  ;;  %v85_v57 = vpop.permute.xlu1 %84  ;;  %657 = vtanh.f32 %v113_v48 }
  0x86   :  { %v106_v59 = vadd.f32 %v90_v56, %v66_v52  ;;  %v107_v60 = vadd.f32 %v90_v56, %v67_v53  ;;  %v108_v61 = vadd.f32 %v90_v56, %v68_v54  ;;  %v109_v63 = vadd.f32 %v90_v56, %v69_v55 }
  0x87   :  { %v102_v2 = vadd.f32 %v85_v57, %v62_v58  ;;  %v103_v5 = vadd.f32 %v85_v57, %v63_v62  ;;  %v104_v7 = vadd.f32 %v85_v57, %v64_v1  ;;  %v105_v9 = vadd.f32 %v85_v57, %v65_v4 }
  0x88   :  { %v652_v0 = vpop.eup %651  ;;  %659 = vtanh.f32 %v106_v59 }
  0x89   :  { %v654_v3 = vpop.eup %653  ;;  %661 = vtanh.f32 %v107_v60  ;;  %188 = vmatpush.msra.mxu0 %v652_v0 }
  0x8a   :  { %v656_v6 = vpop.eup %655  ;;  %663 = vtanh.f32 %v108_v61  ;;  %217 = vmatpush.msra.mxu1 %v654_v3  ;;  %v614_v3 = vld [vmem:[%s941_s3 + $0x20] sm:$0xff] }
  0x8b   :  { %v658_v8 = vpop.eup %657  ;;  %665 = vtanh.f32 %v109_v63  ;;  %246 = vmatpush.msra.mxu2 %v656_v6 }
  0x8c   :  { %667 = vtanh.f32 %v102_v2  ;;  %275 = vmatpush.msra.mxu3 %v658_v8 }
  0x8d   :  { %669 = vtanh.f32 %v103_v5  ;;  %v155_v41 = vpop.permute.xlu0 %154  ;;  %v150_v44 = vpop.permute.xlu1 %149 }
  0x8e   :  { %v660_v10 = vpop.eup %659  ;;  %671 = vtanh.f32 %v104_v7 }
  0x8f   :  { %v662_v11 = vpop.eup %661  ;;  %673 = vtanh.f32 %v105_v9  ;;  %189 = vmatpush.msra.mxu0 %v660_v10 }
  0x90   :  { %v664_v12 = vpop.eup %663  ;;  %218 = vmatpush.msra.mxu1 %v662_v11  ;;  %v615_v11 = vld [vmem:[%s941_s3 + $0x28] sm:$0xff] }
  0x91   :  { %v666_v13 = vpop.eup %665  ;;  %247 = vmatpush.msra.mxu2 %v664_v12  ;;  %v616_v12 = vld [vmem:[%s941_s3 + $0x30] sm:$0xff] }
  0x92   :  { %v668_v15 = vpop.eup %667  ;;  %276 = vmatpush.msra.mxu3 %v666_v13  ;;  %v617_v13 = vld [vmem:[%s941_s3 + $0x38] sm:$0xff] }
  0x93   :  { %v670_v16 = vpop.eup %669  ;;  %190 = vmatpush.msra.mxu0 %v668_v15 }
  0x94   :  { %v672_v17 = vpop.eup %671  ;;  %219 = vmatpush.msra.mxu1 %v670_v16  ;;  %598 = vmatmul.msk.f32.vlgmr.msra.gmra.mxu0 %vm162_vm0, %v134_v14 }
  0x95   :  { %v674_v18 = vpop.eup %673  ;;  %248 = vmatpush.msra.mxu2 %v672_v17  ;;  %602 = vmatmul.msk.f32.vlgmr.msra.gmra.mxu1 %vm162_vm0, %v134_v14 }
  0x96   :  { %277 = vmatpush.msra.mxu3 %v674_v18  ;;  %606 = vmatmul.msk.f32.vlgmr.msra.gmra.mxu2 %vm162_vm0, %v134_v14  ;;  %v320_v18 = vpop.permute.xlu0 %319 }
  0x97   :  { %610 = vmatmul.msk.f32.vlgmr.msra.gmra.mxu3 %vm162_vm0, %v134_v14 }
  0x9c   :  { %599 = vmatmul.msk.f32.gmra.mxu0 %vm162_vm0, %v135_v19 }
  0x9d   :  { %603 = vmatmul.msk.f32.gmra.mxu1 %vm162_vm0, %v135_v19 }
  0x9e   :  { %607 = vmatmul.msk.f32.gmra.mxu2 %vm162_vm0, %v135_v19 }
  0x9f   :  { %611 = vmatmul.msk.f32.gmra.mxu3 %vm162_vm0, %v135_v19 }
  0xa4   :  { %600 = vmatmul.msk.f32.gmra.mxu0 %vm162_vm0, %v136_v20 }
  0xa5   :  { %604 = vmatmul.msk.f32.gmra.mxu1 %vm162_vm0, %v136_v20 }
  0xa6   :  { %608 = vmatmul.msk.f32.gmra.mxu2 %vm162_vm0, %v136_v20 }
  0xa7   :  { %612 = vmatmul.msk.f32.gmra.mxu3 %vm162_vm0, %v136_v20 }
  0xac   :  { %601 = vmatmul.msk.f32.gmra.mxu0 %vm162_vm0, %v137_v21 }
  0xad   :  { %605 = vmatmul.msk.f32.gmra.mxu1 %vm162_vm0, %v137_v21 }
  0xae   :  { %609 = vmatmul.msk.f32.gmra.mxu2 %vm162_vm0, %v137_v21 }
  0xaf   :  { %613 = vmatmul.msk.f32.gmra.mxu3 %vm162_vm0, %v137_v21  ;;  %v325_v21 = vpop.permute.xlu1 %324 }
 0x111   :  { %v192_v22 = vpop.f32.mrf.mxu0 }
 0x112   :  { %v221_v23 = vpop.f32.mrf.mxu1  ;;  %v193_v34 = vadd.f32 %v192_v22, %v145_v33 }
 0x113   :  { %v222_v35 = vadd.f32 %v221_v23, %v145_v33 }
 0x114   :  { %675 = vtanh.f32 %v193_v34 }
 0x115   :  { %677 = vtanh.f32 %v222_v35  ;;  %v926_v35 = vpop.permute.xlu1 %487 }
 0x119   :  { %v250_v24 = vpop.f32.mrf.mxu2  ;;  %v195_v25 = vpop.f32.mrf.mxu0 }
 0x11a   :  { %v279_v26 = vpop.f32.mrf.mxu3  ;;  %v224_v27 = vpop.f32.mrf.mxu1  ;;  %v196_v46 = vadd.f32 %v195_v25, %v150_v44  ;;  %v251_v61 = vadd.f32 %v250_v24, %v145_v33 }
 0x11b   :  { %v225_v47 = vadd.f32 %v224_v27, %v150_v44  ;;  %v676_v49 = vpop.eup %675  ;;  %v280_v63 = vadd.f32 %v279_v26, %v145_v33  ;;  %v330_v24 = vpop.permute.xlu2 %329 }
 0x11c   :  { %v678_v53 = vpop.eup %677 }
 0x121   :  { %v253_v29 = vpop.f32.mrf.mxu2  ;;  %v198_v30 = vpop.f32.mrf.mxu0 }
 0x122   :  { %v282_v31 = vpop.f32.mrf.mxu3  ;;  %v227_v32 = vpop.f32.mrf.mxu1  ;;  %v199_v43 = vadd.f32 %v198_v30, %v155_v41  ;;  %v254_v57 = vadd.f32 %v253_v29, %v150_v44 }
 0x123   :  { %v228_v45 = vadd.f32 %v227_v32, %v155_v41  ;;  %v283_v59 = vadd.f32 %v282_v31, %v150_v44  ;;  %v335_v31 = vpop.permute.xlu0 %334 }
 0x129   :  { %v256_v36 = vpop.f32.mrf.mxu2  ;;  %v201_v37 = vpop.f32.mrf.mxu0 }
 0x12a   :  { %v285_v38 = vpop.f32.mrf.mxu3  ;;  %v202_v39 = vadd.f32 %v201_v37, %v160_v28  ;;  %v230_v40 = vpop.f32.mrf.mxu1  ;;  %v257_v50 = vadd.f32 %v256_v36, %v155_v41 }
 0x12b   :  { %v231_v42 = vadd.f32 %v230_v40, %v160_v28  ;;  %v286_v54 = vadd.f32 %v285_v38, %v155_v41 }
 0x12c   :  { %679 = vtanh.f32 %v202_v39 }
 0x12d   :  { %681 = vtanh.f32 %v231_v42 }
 0x12e   :  { %683 = vtanh.f32 %v199_v43 }
 0x12f   :  { %685 = vtanh.f32 %v228_v45 }
 0x130   :  { %687 = vtanh.f32 %v196_v46  ;;  %v493_v46 = vpop.permute.xlu2 %492 }
 0x131   :  { %v259_v48 = vpop.f32.mrf.mxu2  ;;  %689 = vtanh.f32 %v225_v47 }
 0x132   :  { %v260_v51 = vadd.f32 %v259_v48, %v160_v28  ;;  %v288_v52 = vpop.f32.mrf.mxu3  ;;  %v680_v56 = vpop.eup %679 }
 0x133   :  { %v289_v55 = vadd.f32 %v288_v52, %v160_v28  ;;  %v682_v58 = vpop.eup %681  ;;  %361 = vmatpush.msrb.mxu0 %v680_v56 }
 0x134   :  { %691 = vtanh.f32 %v260_v51  ;;  %v684_v60 = vpop.eup %683  ;;  %390 = vmatpush.msrb.mxu1 %v682_v58 }
 0x135   :  { %693 = vtanh.f32 %v289_v55  ;;  %v686_v62 = vpop.eup %685  ;;  %362 = vmatpush.msrb.mxu0 %v684_v60  ;;  %v498_v55 = vpop.permute.xlu0 %497 }
 0x136   :  { %695 = vtanh.f32 %v257_v50  ;;  %v688_v0 = vpop.eup %687  ;;  %391 = vmatpush.msrb.mxu1 %v686_v62  ;;  %v503_v62 = vpop.permute.xlu1 %502 }
 0x137   :  { %697 = vtanh.f32 %v286_v54  ;;  %v690_v1 = vpop.eup %689  ;;  %363 = vmatpush.msrb.mxu0 %v688_v0 }
 0x138   :  { %699 = vtanh.f32 %v254_v57  ;;  %392 = vmatpush.msrb.mxu1 %v690_v1 }
 0x139   :  { %701 = vtanh.f32 %v283_v59  ;;  %364 = vmatpush.msrb.mxu0 %v676_v49 }
 0x13a   :  { %v692_v2 = vpop.eup %691  ;;  %703 = vtanh.f32 %v251_v61  ;;  %393 = vmatpush.msrb.mxu1 %v678_v53  ;;  %622 = vmatmul.msk.f32.vlgmr.msrb.gmra.mxu0 %vm162_vm0, %v614_v3 }
 0x13b   :  { %v694_v4 = vpop.eup %693  ;;  %705 = vtanh.f32 %v280_v63  ;;  %419 = vmatpush.msrb.mxu2 %v692_v2  ;;  %626 = vmatmul.msk.f32.vlgmr.msrb.gmra.mxu1 %vm162_vm0, %v614_v3 }
 0x13c   :  { %v696_v5 = vpop.eup %695  ;;  %448 = vmatpush.msrb.mxu3 %v694_v4 }
 0x13d   :  { %v698_v6 = vpop.eup %697  ;;  %420 = vmatpush.msrb.mxu2 %v696_v5 }
 0x13e   :  { %v700_v7 = vpop.eup %699  ;;  %449 = vmatpush.msrb.mxu3 %v698_v6 }
 0x13f   :  { %v702_v8 = vpop.eup %701  ;;  %421 = vmatpush.msrb.mxu2 %v700_v7 }
 0x140   :  { %v704_v9 = vpop.eup %703  ;;  %450 = vmatpush.msrb.mxu3 %v702_v8 }
 0x141   :  { %v706_v10 = vpop.eup %705  ;;  %422 = vmatpush.msrb.mxu2 %v704_v9 }
 0x142   :  { %451 = vmatpush.msrb.mxu3 %v706_v10  ;;  %630 = vmatmul.msk.f32.vlgmr.msrb.gmra.mxu2 %vm162_vm0, %v614_v3 }
 0x143   :  { %634 = vmatmul.msk.f32.vlgmr.msrb.gmra.mxu3 %vm162_vm0, %v614_v3  ;;  %623 = vmatmul.msk.f32.gmra.mxu0 %vm162_vm0, %v615_v11 }
 0x144   :  { %627 = vmatmul.msk.f32.gmra.mxu1 %vm162_vm0, %v615_v11 }
 0x14a   :  { %631 = vmatmul.msk.f32.gmra.mxu2 %vm162_vm0, %v615_v11 }
 0x14b   :  { %635 = vmatmul.msk.f32.gmra.mxu3 %vm162_vm0, %v615_v11  ;;  %624 = vmatmul.msk.f32.gmra.mxu0 %vm162_vm0, %v616_v12 }
 0x14c   :  { %628 = vmatmul.msk.f32.gmra.mxu1 %vm162_vm0, %v616_v12 }
 0x152   :  { %632 = vmatmul.msk.f32.gmra.mxu2 %vm162_vm0, %v616_v12 }
 0x153   :  { %636 = vmatmul.msk.f32.gmra.mxu3 %vm162_vm0, %v616_v12  ;;  %625 = vmatmul.msk.f32.gmra.mxu0 %vm162_vm0, %v617_v13 }
 0x154   :  { %629 = vmatmul.msk.f32.gmra.mxu1 %vm162_vm0, %v617_v13 }
 0x15a   :  { %633 = vmatmul.msk.f32.gmra.mxu2 %vm162_vm0, %v617_v13 }
 0x15b   :  { %637 = vmatmul.msk.f32.gmra.mxu3 %vm162_vm0, %v617_v13 }
 0x1b7   :  { %v366_v14 = vpop.f32.mrf.mxu0 }
 0x1b8   :  { %v395_v15 = vpop.f32.mrf.mxu1  ;;  %v367_v22 = vadd.f32 %v366_v14, %v320_v18 }
 0x1b9   :  { %v396_v23 = vadd.f32 %v395_v15, %v320_v18 }
 0x1ba   :  { %707 = vtanh.f32 %v367_v22 }
 0x1bb   :  { %709 = vtanh.f32 %v396_v23 }
 0x1c0   :  { %v369_v16 = vpop.f32.mrf.mxu0  ;;  %v708_v34 = vpop.eup %707 }
 0x1c1   :  { %v398_v17 = vpop.f32.mrf.mxu1  ;;  %v370_v25 = vadd.f32 %v369_v16, %v325_v21  ;;  %v710_v36 = vpop.eup %709  ;;  %v505_v56 = vmul.f32 %v708_v34, %v926_v35 }
 0x1c2   :  { %v399_v26 = vadd.f32 %v398_v17, %v325_v21  ;;  %v506_v58 = vmul.f32 %v710_v36, %v926_v35 }
 0x1c3   :  { %711 = vtanh.f32 %v370_v25 }
 0x1c4   :  { %713 = vtanh.f32 %v399_v26 }
 0x1c5   :  { %v424_v19 = vpop.f32.mrf.mxu2 }
 0x1c6   :  { %v453_v20 = vpop.f32.mrf.mxu3  ;;  %v425_v40 = vadd.f32 %v424_v19, %v320_v18 }
 0x1c7   :  { %v454_v44 = vadd.f32 %v453_v20, %v320_v18 }
 0x1c8   :  { %v372_v27 = vpop.f32.mrf.mxu0 }
 0x1c9   :  { %v401_v28 = vpop.f32.mrf.mxu1  ;;  %v373_v29 = vadd.f32 %v372_v27, %v330_v24  ;;  %v712_v39 = vpop.eup %711 }
 0x1ca   :  { %v402_v30 = vadd.f32 %v401_v28, %v330_v24  ;;  %v714_v43 = vpop.eup %713  ;;  %v509_v52 = vmul.f32 %v712_v39, %v493_v46 }
 0x1cb   :  { %715 = vtanh.f32 %v373_v29  ;;  %v510_v53 = vmul.f32 %v714_v43, %v493_v46 }
 0x1cc   :  { %717 = vtanh.f32 %v402_v30  ;;  %v521_v63 = vadd.f32 %v509_v52, %v505_v56 }
 0x1cd   :  { %v427_v32 = vpop.f32.mrf.mxu2  ;;  %v530_v0 = vadd.f32 %v510_v53, %v506_v58 }
 0x1ce   :  { %v456_v33 = vpop.f32.mrf.mxu3  ;;  %v428_v47 = vadd.f32 %v427_v32, %v325_v21 }
 0x1cf   :  { %v457_v49 = vadd.f32 %v456_v33, %v325_v21 }
 0x1d0   :  { %v375_v37 = vpop.f32.mrf.mxu0 }
 0x1d1   :  { %v404_v38 = vpop.f32.mrf.mxu1  ;;  %v376_v41 = vadd.f32 %v375_v37, %v335_v31  ;;  %v716_v45 = vpop.eup %715 }
 0x1d2   :  { %v405_v42 = vadd.f32 %v404_v38, %v335_v31  ;;  %v718_v48 = vpop.eup %717  ;;  %v513_v59 = vmul.f32 %v716_v45, %v498_v55 }
 0x1d3   :  { %719 = vtanh.f32 %v376_v41  ;;  %v514_v60 = vmul.f32 %v718_v48, %v498_v55 }
 0x1d4   :  { %721 = vtanh.f32 %v405_v42  ;;  %v522_v4 = vadd.f32 %v521_v63, %v513_v59 }
 0x1d5   :  { %v430_v50 = vpop.f32.mrf.mxu2  ;;  %723 = vtanh.f32 %v425_v40  ;;  %v531_v5 = vadd.f32 %v530_v0, %v514_v60 }
 0x1d6   :  { %v459_v51 = vpop.f32.mrf.mxu3  ;;  %v431_v54 = vadd.f32 %v430_v50, %v330_v24  ;;  %725 = vtanh.f32 %v454_v44 }
 0x1d7   :  { %v460_v57 = vadd.f32 %v459_v51, %v330_v24  ;;  %727 = vtanh.f32 %v428_v47  ;;  %v558_v51 = vstv %s944_s6  ;;  %s589_s6 = sshll.u32 %s945_s7, 4  ;;  %s590_s6 = int_to_ptr.hbm [resolvable:$true] %s589_s6 }
 0x1d8   :  { %729 = vtanh.f32 %v457_v49 }
 0x1d9   :  { %v720_v61 = vpop.eup %719  ;;  %731 = vtanh.f32 %v431_v54 }
 0x1da   :  { %v722_v1 = vpop.eup %721  ;;  %v517_v2 = vmul.f32 %v720_v61, %v503_v62  ;;  %733 = vtanh.f32 %v460_v57  ;;  %v577_v61 = vlaneseq }
 0x1db   :  { %v724_v3 = vpop.eup %723  ;;  %v518_v6 = vmul.f32 %v722_v1, %v503_v62 }
 0x1dc   :  { %v726_v7 = vpop.eup %725  ;;  %v523_v11 = vadd.f32 %v522_v4, %v517_v2  ;;  %v507_v23 = vmul.f32 %v724_v3, %v926_v35  ;;  %vm579_vm4 = vcmp.lt.s32.totalorder %v577_v61, 512 }
 0x1dd   :  { %v433_v8 = vpop.f32.mrf.mxu2  ;;  %v728_v10 = vpop.eup %727  ;;  %v532_v12 = vadd.f32 %v531_v5, %v518_v6  ;;  %v508_v25 = vmul.f32 %v726_v7, %v926_v35 }
 0x1de   :  { %v462_v9 = vpop.f32.mrf.mxu3  ;;  %v434_v13 = vadd.f32 %v433_v8, %v335_v31  ;;  %v730_v15 = vpop.eup %729  ;;  %v511_v19 = vmul.f32 %v728_v10, %v493_v46  ;;  %v524_v21 = vrot.slane %v523_v11, 4 }
 0x1df   :  { %v463_v14 = vadd.f32 %v462_v9, %v335_v31  ;;  %v732_v16 = vpop.eup %731  ;;  %v533_v17 = vrot.slane %v532_v12, 4  ;;  %v512_v20 = vmul.f32 %v730_v15, %v493_v46 }
 0x1e0   :  { %735 = vtanh.f32 %v434_v13  ;;  %v734_v18 = vpop.eup %733  ;;  %v515_v24 = vmul.f32 %v732_v16, %v498_v55  ;;  %v539_v28 = vadd.f32 %v511_v19, %v507_v23  ;;  %v525_v31 = vadd.f32 %v524_v21, %v523_v11 }
 0x1e1   :  { %737 = vtanh.f32 %v463_v14  ;;  %v534_v22 = vadd.f32 %v533_v17, %v532_v12  ;;  %v516_v27 = vmul.f32 %v734_v18, %v498_v55  ;;  %v548_v30 = vadd.f32 %v512_v20, %v508_v25 }
 0x1e2   :  { %v540_v33 = vadd.f32 %v539_v28, %v515_v24  ;;  %v526_v40 = vrot.slane %v525_v31, 2 }
 0x1e3   :  { %v535_v26 = vrot.slane %v534_v22, 2  ;;  %v549_v37 = vadd.f32 %v548_v30, %v516_v27 }
 0x1e4   :  { %v527_v35 = vadd.f32 %v526_v40, %v525_v31 }
 0x1e5   :  { %v536_v36 = vadd.f32 %v535_v26, %v534_v22 }
 0x1e6   :  { %v736_v29 = vpop.eup %735  ;;  %v528_v53 = vrot.slane %v527_v35, 1 }
 0x1e7   :  { %v738_v32 = vpop.eup %737  ;;  %v519_v34 = vmul.f32 %v736_v29, %v503_v62  ;;  %v537_v44 = vrot.slane %v536_v36, 1 }
 0x1e8   :  { %v520_v38 = vmul.f32 %v738_v32, %v503_v62  ;;  %v529_v58 = vadd.f32 %v528_v53, %v527_v35 }
 0x1e9   :  { %v541_v39 = vadd.f32 %v540_v33, %v519_v34  ;;  %v538_v49 = vadd.f32 %v537_v44, %v536_v36 }
 0x1ea   :  { %v550_v41 = vadd.f32 %v549_v37, %v520_v38  ;;  %v559_v1 = vadd.f32 %v558_v51, %v529_v58 }
 0x1eb   :  { %v542_v42 = vrot.slane %v541_v39, 4  ;;  %v560_v56 = vadd.f32 %v558_v51, %v538_v49 }
 0x1ec   :  { %v551_v43 = vrot.slane %v550_v41, 4 }
 0x1ed   :  { %v543_v45 = vadd.f32 %v542_v42, %v541_v39  ;;  %v567_v63 = vrot.slane %v560_v56, 7 }
 0x1ee   :  { %v552_v46 = vadd.f32 %v551_v43, %v550_v41 }
 0x1ef   :  { %v544_v47 = vrot.slane %v543_v45, 2  ;;  %v571_v3 = vsel %vm570_vm1, %v559_v1, %v567_v63 }
 0x1f0   :  { %v553_v48 = vrot.slane %v552_v46, 2 }
 0x1f1   :  { %v545_v50 = vadd.f32 %v544_v47, %v543_v45 }
 0x1f2   :  { %v554_v52 = vadd.f32 %v553_v48, %v552_v46 }
 0x1f3   :  { %v546_v54 = vrot.slane %v545_v50, 1 }
 0x1f4   :  { %v555_v55 = vrot.slane %v554_v52, 1 }
 0x1f5   :  { %v547_v57 = vadd.f32 %v546_v54, %v545_v50 }
 0x1f6   :  { %v556_v59 = vadd.f32 %v555_v55, %v554_v52 }
 0x1f7   :  { %v561_v60 = vadd.f32 %v558_v51, %v547_v57 }
 0x1f8   :  { %v562_v62 = vadd.f32 %v558_v51, %v556_v59 }
 0x1f9   :  { %v568_v0 = vrot.slane %v561_v60, 6 }
 0x1fa   :  { %v569_v2 = vrot.slane %v562_v62, 5 }
 0x1fc   :  { %v573_v4 = vsel %vm572_vm2, %v568_v0, %v569_v2 }
 0x1fd   :  { %v575_v5 = vsel %vm574_vm3, %v571_v3, %v573_v4 }
 0x1fe   :  { %581 = vst.msk [vmem:[#allocation3] sm:$0xf] %vm579_vm4, %v575_v5 }
 0x1ff   :  { %592 = dma.vmem_to_hbm [thread:$0]  %s588_s8, 64, %s590_s6, [#allocation4]  }
 0x200   :  { %763 = dma.done.wait [#allocation4], 64  }
 0x201   :  { %764 = vsyncadd [#allocation4], 4294967232 }
 0x202   :  { %597 = vsyncpa [#allocation4], 1 }

</bundles_post_ra>
